<compile_context>
chip_gen: v7x
topology: tpu7x:2x2x1
jax: 0.10.0
libtpu: 0.0.40
codegen_flags: <defaults>
</compile_context>

<pallas_src>
import jax
import jax.numpy as jnp
from jax.experimental import pallas as pl
from jax.experimental.pallas import tpu as pltpu


def _round_up(x, m):
    return ((x + m - 1) // m) * m


def _pick_tile_m(M, K, Ep, in_bytes, out_bytes, budget_bytes=24 * 1024 * 1024):
    """Largest power-of-two M-tile whose pipelined footprint fits the budget,
    capped at (M rounded up to the sublane granule)."""
    sub = max(8, 32 // in_bytes)  # f32 -> 8, bf16 -> 16, int8/fp8 -> 32
    tm = 2048
    while tm > sub:
        footprint = (2 * tm * K * in_bytes        # double-buffered input tiles
                     + K * Ep * in_bytes          # resident weight
                     + 2 * Ep * 4                 # resident bias (f32)
                     + 2 * tm * Ep * out_bytes)   # double-buffered output tiles
        if footprint <= budget_bytes:
            break
        tm //= 2
    return max(sub, min(tm, _round_up(M, sub)))


def _patch_embed_kernel(x_ref, w_ref, b_ref, o_ref):
    # x_ref: (TM, K) patch rows; w_ref: (K, Ep); b_ref: (1, Ep); o_ref: (TM, Ep)
    acc = jnp.dot(x_ref[...], w_ref[...], preferred_element_type=jnp.float32)
    o_ref[...] = (acc + b_ref[...]).astype(o_ref.dtype)


def patch_embed_forward(x, weight, bias, patch_size, *, compute_dtype=None):
    """x: (B, C, H, W); weight: (E, C, ph, pw); bias: (E,).

    Returns (B, Ho*Wo, E), matching PyTorch's proj(x).flatten(2).transpose(1,2).
    compute_dtype (e.g. jnp.bfloat16) optionally casts the matmul inputs;
    accumulation is always f32, output keeps x.dtype.
    """
    B, C, H, W = x.shape
    E = weight.shape[0]
    ph, pw = patch_size
    assert H % ph == 0 and W % pw == 0
    Ho, Wo = H // ph, W // pw
    out_dtype = x.dtype

    # ---- glue: non-overlapping patch extraction (matches conv receptive fields)
    # (B, C, Ho, ph, Wo, pw) -> (B, Ho, Wo, C, ph, pw) -> (B*Ho*Wo, C*ph*pw)
    xp = x.reshape(B, C, Ho, ph, Wo, pw).transpose(0, 2, 4, 1, 3, 5)
    xp = xp.reshape(B * Ho * Wo, C * ph * pw)
    # weight (E, C, ph, pw) -> (C*ph*pw, E)   (matches PyTorch conv contraction)
    w2d = weight.reshape(E, C * ph * pw).T
    M, K = xp.shape

    if compute_dtype is not None:
        xp = xp.astype(compute_dtype)
        w2d = w2d.astype(compute_dtype)
    b_f32 = bias.astype(jnp.float32)

    in_bytes = jnp.dtype(xp.dtype).itemsize
    out_bytes = jnp.dtype(out_dtype).itemsize

    # ---- pad to lane/sublane friendly shapes
    Ep = _round_up(E, 128)                      # lane-dense output stores
    TM = _pick_tile_m(M, K, Ep, in_bytes, out_bytes)
    Mp = _round_up(M, TM)                       # tail block stays in bounds

    if Mp != M:
        xp = jnp.pad(xp, ((0, Mp - M), (0, 0)))
    if Ep != E:
        w2d = jnp.pad(w2d, ((0, 0), (0, Ep - E)))
        b_f32 = jnp.pad(b_f32, (0, Ep - E))
    b2d = b_f32.reshape(1, Ep)

    nm = Mp // TM
    cost = pl.CostEstimate(
        flops=2 * Mp * K * Ep,
        transcendentals=0,
        bytes_accessed=(Mp * K * in_bytes + K * Ep * in_bytes
                        + Ep * 4 + Mp * Ep * out_bytes),
    )

    out = pl.pallas_call(
        _patch_embed_kernel,
        out_shape=jax.ShapeDtypeStruct((Mp, Ep), out_dtype),
        grid_spec=pltpu.PrefetchScalarGridSpec(
            num_scalar_prefetch=0,
            grid=(nm,),
            in_specs=[
                pl.BlockSpec((TM, K), lambda i: (i, 0)),   # patch rows, tiled
                pl.BlockSpec((K, Ep), lambda i: (0, 0)),   # weight, resident
                pl.BlockSpec((1, Ep), lambda i: (0, 0)),   # bias, resident
            ],
            out_specs=pl.BlockSpec((TM, Ep), lambda i: (i, 0)),
        ),
        compiler_params=pltpu.CompilerParams(
            dimension_semantics=("parallel",),          # megacore on v7x
            vmem_limit_bytes=48 * 1024 * 1024),
        cost_estimate=cost,
    )(xp, w2d, b2d)

    # Unpad, then (B*Ho*Wo, E) -> (B, num_patches, E)
    return out[:M, :E].reshape(B, Ho * Wo, E)


# Pure-JAX reference (conv via lax) for correctness check.
def _reference(x, weight, bias, patch_size):
    y = jax.lax.conv_general_dilated(
        x, weight, window_strides=patch_size, padding="VALID",
        dimension_numbers=("NCHW", "OIHW", "NCHW"))
    y = y + bias.reshape(1, -1, 1, 1)
    B, E, Ho, Wo = y.shape
    return y.reshape(B, E, Ho * Wo).transpose(0, 2, 1)


if __name__ == "__main__":
    # Small shapes consistent with the module: img_size=16, patch_size=4,
    # in_chans=4, embed_dim=32, batch=2.   norm_layer=None (default).
    B, C, H, W = 2, 4, 16, 16
    patch_size = (4, 4)
    embed_dim = 32

    key = jax.random.PRNGKey(0)
    kx, kw, kb = jax.random.split(key, 3)
    x = jax.random.normal(kx, (B, C, H, W), dtype=jnp.float32)
    # Deterministic synthetic conv parameters (shapes from nn.Conv2d).
    weight = jax.random.normal(
        kw, (embed_dim, C, patch_size[0], patch_size[1]), dtype=jnp.float32) * 0.05
    bias = jax.random.normal(kb, (embed_dim,), dtype=jnp.float32) * 0.05

    ref = _reference(x, weight, bias, patch_size)

    # f32 path: strict check against the conv reference.
    out = patch_embed_forward(x, weight, bias, patch_size)
    out = jax.block_until_ready(out)
    assert out.shape == (B, (H // patch_size[0]) * (W // patch_size[1]), embed_dim)
    assert jnp.allclose(out, ref, atol=1e-4, rtol=1e-4), "f32 mismatch vs reference"

    # bf16 MXU path (v6e/v7x-friendly): f32 accumulation, looser tolerance.
    out_bf16 = patch_embed_forward(x, weight, bias, patch_size,
                                   compute_dtype=jnp.bfloat16)
    out_bf16 = jax.block_until_ready(out_bf16)
    assert out_bf16.shape == out.shape
    assert jnp.allclose(out_bf16, ref, atol=5e-2, rtol=5e-2), "bf16 mismatch vs reference"

    print("KERNEL_OK")
</pallas_src>

<mosaic_0001>
module attributes {stable_mosaic.version = 11 : i64} {
  func.func @_patch_embed_kernel(%arg0: i32, %arg1: memref<32x64xf32, #tpu.memory_space<vmem>>, %arg2: memref<64x128xf32, #tpu.memory_space<vmem>>, %arg3: memref<1x128xf32, #tpu.memory_space<vmem>>, %arg4: memref<32x128xf32, #tpu.memory_space<vmem>>) attributes {dimension_semantics = [#tpu.dimension_semantics<parallel>], iteration_bounds = array<i64: 1>, scalar_prefetch = 0 : i64, scratch_operands = 0 : i64, tpu.core_type = #tpu.core_type<tc>, window_params = [{transform_indices = @transform_0, window_bounds = array<i64: 32, 64>}, {pipeline_mode = #tpu.pipeline_mode<synchronous>, transform_indices = @transform_1, window_bounds = array<i64: 64, 128>}, {pipeline_mode = #tpu.pipeline_mode<synchronous>, transform_indices = @transform_2, window_bounds = array<i64: 1, 128>}, {transform_indices = @transform_3, window_bounds = array<i64: 32, 128>}]} {
    %c0 = arith.constant 0 : index
    %c0_0 = arith.constant 0 : index
    %0 = vector.load %arg1[%c0, %c0_0] : memref<32x64xf32, #tpu.memory_space<vmem>>, vector<32x64xf32>
    %c0_1 = arith.constant 0 : index
    %c0_2 = arith.constant 0 : index
    %1 = vector.load %arg2[%c0_1, %c0_2] : memref<64x128xf32, #tpu.memory_space<vmem>>, vector<64x128xf32>
    %cst = arith.constant dense<0.000000e+00> : vector<32x128xf32>
    %2 = tpu.matmul %0, %1, %cst {dimension_numbers = #tpu.dot_dimension_numbers<[1], [0], [0], [1], [0, 0, 1, 1], [], []>} : vector<32x64xf32>, vector<64x128xf32>, vector<32x128xf32> -> vector<32x128xf32>
    %c0_3 = arith.constant 0 : index
    %c0_4 = arith.constant 0 : index
    %3 = vector.load %arg3[%c0_3, %c0_4] : memref<1x128xf32, #tpu.memory_space<vmem>>, vector<1x128xf32>
    %4 = vector.broadcast %3 : vector<1x128xf32> to vector<32x128xf32>
    %5 = arith.addf %2, %4 : vector<32x128xf32>
    %c0_5 = arith.constant 0 : index
    %c0_6 = arith.constant 0 : index
    %6 = vector.load %arg4[%c0_5, %c0_6] : memref<32x128xf32, #tpu.memory_space<vmem>>, vector<32x128xf32>
    tpu.vector_store %arg4[%c0_5, %c0_6], %5 {strides = array<i32>} : memref<32x128xf32, #tpu.memory_space<vmem>>, vector<32x128xf32>,
    return
  }
  func.func @transform_0(%arg0: i32) -> (i32, i32) {
    %c0_i32 = arith.constant 0 : i32
    %c0_i32_0 = arith.constant 0 : i32
    return %arg0, %c0_i32 : i32, i32
  }
  func.func @transform_1(%arg0: i32) -> (i32, i32) {
    %c0_i32 = arith.constant 0 : i32
    %c0_i32_0 = arith.constant 0 : i32
    %c0_i32_1 = arith.constant 0 : i32
    return %c0_i32, %c0_i32_0 : i32, i32
  }
  func.func @transform_2(%arg0: i32) -> (i32, i32) {
    %c0_i32 = arith.constant 0 : i32
    %c0_i32_0 = arith.constant 0 : i32
    %c0_i32_1 = arith.constant 0 : i32
    return %c0_i32, %c0_i32_0 : i32, i32
  }
  func.func @transform_3(%arg0: i32) -> (i32, i32) {
    %c0_i32 = arith.constant 0 : i32
    %c0_i32_0 = arith.constant 0 : i32
    return %arg0, %c0_i32 : i32, i32
  }
}

</mosaic_0001>

<bundles_post_ra>
// kernel: tpu_custom_call.1
= control target key start
LH: loop header
LB: loop body
LE: loop exit
PB: predicated region body
PF: predicated region fallthrough
CT: control target
= control target key end

     0   :  { %8 = vsyncpa [#allocation3], 0  ;;  %s399_s0 = inlined_call_operand.hbm [shape: f32[32,64], index: 0, kind: input, shape index: {}]   ;;  %s400_s1 = inlined_call_operand.hbm [shape: f32[64,128], index: 1, kind: input, shape index: {}]   ;;  %s401_s2 = inlined_call_operand.vmem [shape: f32[1,128], index: 2, kind: input, shape index: {}]   ;;  %s402_s3 = inlined_call_operand.hbm [shape: f32[32,128], index: 3, kind: output, shape index: {}]  }
   0x1   :  { %9 = vsyncpa [#allocation6], 0 }
   0x2   :  { %10 = vsyncpa [#allocation4], 0  ;;  %s322_s12 = smov [#allocation2]   ;;  %s250_s16 = scalar_lea.hbm %s399_s0, 512 }
   0x3   :  { %s16_s13 = sshll.u32 %s322_s12, 4  ;;  %p251_p0 = scmp.ne.s32.totalorder %s399_s0, %s250_s16  ;;  %s17_s13 = int_to_ptr.vmem [resolvable:$true] %s16_s13 }
   0x4   :  { %p254_p1 = scmp.lt.u32.totalorder %s250_s16, %s399_s0 }
   0x6   :  { %p256_p2 = pnand %p254_p1, %p251_p0 }
   0x8   :  { %259 = shalt.err (!%p256_p2)
}
   0x9   :  { %s260_s21 = scalar_lea.vmem %s17_s13, 512  ;;  %p265_p4 = scmp.lt.s32.totalorder %s17_s13, %s17_s13 }
   0xa   :  { %p261_p3 = scmp.ne.s32.totalorder %s17_s13, %s260_s21  ;;  %p266_p5 = scmp.lt.s32.totalorder %s260_s21, %s260_s21 }
   0xc   :  { %p267_p6 = por %p266_p5, %p265_p4 }
   0xe   :  { %p268_p7 = pnand %p267_p6, %p261_p3 }
  0x10   :  { %271 = shalt.err (!%p268_p7)
}
  0x11   :  { %s323_s22 = smov 128   ;;  %s324_s23 = smov 8  }
  0x12   :  { %22 = dma.hbm_to_vmem [thread:$0]  %s399_s0, 512, %s17_s13, [#allocation3], %s323_s22, %s323_s22, %s324_s23  }
  0x13   :  { %s325_s26 = smov [#allocation5]   ;;  %s272_s30 = scalar_lea.hbm %s400_s1, 1024 }
  0x14   :  { %s28_s27 = sshll.u32 %s325_s26, 4  ;;  %p273_p8 = scmp.ne.s32.totalorder %s400_s1, %s272_s30  ;;  %s29_s27 = int_to_ptr.vmem [resolvable:$true] %s28_s27 }
  0x15   :  { %p276_p9 = scmp.lt.u32.totalorder %s272_s30, %s400_s1 }
  0x17   :  { %p278_p10 = pnand %p276_p9, %p273_p8 }
  0x19   :  { %281 = shalt.err (!%p278_p10)
}
  0x1a   :  { %s282_s8 = scalar_lea.vmem %s29_s27, 1024  ;;  %p287_p12 = scmp.lt.s32.totalorder %s29_s27, %s29_s27 }
  0x1b   :  { %p283_p11 = scmp.ne.s32.totalorder %s29_s27, %s282_s8  ;;  %p288_p13 = scmp.lt.s32.totalorder %s282_s8, %s282_s8 }
  0x1d   :  { %p289_p0 = por %p288_p13, %p287_p12 }
  0x1f   :  { %p290_p1 = pnand %p289_p0, %p283_p11 }
  0x21   :  { %293 = shalt.err (!%p290_p1)
}
  0x22   :  { %34 = dma.hbm_to_vmem [thread:$0]  %s400_s1, 1024, %s29_s27, [#allocation6], %s323_s22, %s323_s22, %s324_s23  }
  0x23   :  { %316 = dma.done.wait [#allocation3], 512  }
  0x24   :  { %317 = vsyncadd [#allocation3], 4294966784 }
  0x25   :  { %318 = dma.done.wait [#allocation6], 1024  }
  0x26   :  { %319 = vsyncadd [#allocation6], 4294966272  ;;  %v47_v0 = vld [vmem:[#allocation5] sm:$0xff]  ;;  %v48_v1 = vld [vmem:[#allocation5 + $0x8] sm:$0xff]  ;;  %vm62_vm0 = vcmask 523264   ;;  %s326_s11 = smov [#allocation7]  }
  0x27   :  { %v49_v2 = vld [vmem:[#allocation5 + $0x10] sm:$0xff]  ;;  %v221_v3 = vpack.c.bf16 %v48_v1, %v47_v0  ;;  %v50_v4 = vld [vmem:[#allocation5 + $0x18] sm:$0xff]  ;;  %v51_v6 = vld [vmem:[#allocation5 + $0x20] sm:$0xff]  ;;  %s169_s12 = sshll.u32 %s326_s11, 4  ;;  %s170_s12 = int_to_ptr.vmem [resolvable:$true] %s169_s12 }
  0x28   :  { %v225_v5 = vpack.c.bf16 %v50_v4, %v49_v2  ;;  %v52_v7 = vld [vmem:[#allocation5 + $0x28] sm:$0xff]  ;;  %v43_v8 = vld [vmem:[#allocation2] sm:$0xff]  ;;  %v45_v9 = vld [vmem:[#allocation2 + $0x10] sm:$0xff]  ;;  %s294_s13 = scalar_lea.vmem %s170_s12, 512  ;;  %p299_p3 = scmp.lt.s32.totalorder %s170_s12, %s170_s12 }
  0x29   :  { %222 = vmatprep.subr.bf16.mxu0 %v221_v3  ;;  %237 = vmatprep.subr.bf16.mxu1 %v221_v3  ;;  %v229_v10 = vpack.c.bf16 %v52_v7, %v51_v6  ;;  %v53_v11 = vld [vmem:[#allocation5 + $0x30] sm:$0xff]  ;;  %v54_v12 = vld [vmem:[#allocation5 + $0x38] sm:$0xff]  ;;  %v44_v14 = vld [vmem:[#allocation2 + $0x8] sm:$0xff]  ;;  %p295_p2 = scmp.ne.s32.totalorder %s170_s12, %s294_s13  ;;  %p300_p4 = scmp.lt.s32.totalorder %s294_s13, %s294_s13 }
  0x2a   :  { %224 = vmatpush3.bf16.msra.mxu0 %v221_v3  ;;  %241 = vmatpush3.bf16.msra.mxu1 %v221_v3  ;;  %v233_v13 = vpack.c.bf16 %v54_v12, %v53_v11  ;;  %v46_v15 = vld [vmem:[#allocation2 + $0x18] sm:$0xff]  ;;  %v182_v16 = vld [vmem:[%s401_s2] ss:$0 sm:$0xff] }
  0x2b   :  { %226 = vmatprep.subr.bf16.mxu0 %v225_v5  ;;  %238 = vmatprep.subr.bf16.mxu1 %v225_v5  ;;  %p301_p5 = por %p300_p4, %p299_p3 }
  0x2c   :  { %215 = vmatprep.mubr.msk.f32.mxu0 %vm62_vm0, %v43_v8  ;;  %218 = vmatprep.mubr.msk.f32.mxu1 %vm62_vm0, %v45_v9 }
  0x2d   :  { %p302_p6 = pnand %p301_p5, %p295_p2 }
  0x2e   :  { %228 = vmatpush3.bf16.msra.mxu0 %v225_v5  ;;  %242 = vmatpush3.bf16.msra.mxu1 %v225_v5 }
  0x2f   :  { %230 = vmatprep.subr.bf16.mxu0 %v229_v10  ;;  %239 = vmatprep.subr.bf16.mxu1 %v229_v10 }
  0x32   :  { %232 = vmatpush3.bf16.msra.mxu0 %v229_v10  ;;  %243 = vmatpush3.bf16.msra.mxu1 %v229_v10 }
  0x33   :  { %234 = vmatprep.subr.bf16.mxu0 %v233_v13  ;;  %240 = vmatprep.subr.bf16.mxu1 %v233_v13 }
  0x36   :  { %236 = vmatpush3.bf16.msra.mxu0 %v233_v13  ;;  %244 = vmatpush3.bf16.msra.mxu1 %v233_v13 }
  0x39   :  { %216 = vmatmul.mubr.msk.f32.vlgmr.msra.gmra.mrb[0].mxu0 %vm62_vm0, %v44_v14  ;;  %219 = vmatmul.mubr.msk.f32.vlgmr.msra.gmra.mrb[0].mxu1 %vm62_vm0, %v46_v15 }
 0x10c   :  { %v217_v17 = vpop.f32.mrb[0].mxu0  ;;  %v220_v18 = vpop.f32.mrb[0].mxu1 }
 0x10d   :  { %v147_v19 = vadd.f32 %v217_v17, %v182_v16  ;;  %v157_v20 = vadd.f32 %v220_v18, %v182_v16  ;;  %v141_v21 = vpop.f32.mrb[1].mxu0  ;;  %v151_v22 = vpop.f32.mrb[1].mxu1 }
 0x10e   :  { %v142_v23 = vadd.f32 %v182_v16, %v141_v21  ;;  %v152_v24 = vadd.f32 %v182_v16, %v151_v22 }
 0x10f   :  { %161 = vst [vmem:[#allocation7 + $0x8] sm:$0xff] %v147_v19  ;;  %163 = vst [vmem:[#allocation7 + $0x18] sm:$0xff] %v157_v20 }
 0x110   :  { %160 = vst [vmem:[#allocation7] sm:$0xff] %v142_v23  ;;  %162 = vst [vmem:[#allocation7 + $0x10] sm:$0xff] %v152_v24 }
 0x111   :  { %305 = shalt.err (!%p302_p6)
}
 0x112   :  { %s306_s15 = scalar_lea.hbm %s402_s3, 512 }
 0x113   :  { %p307_p7 = scmp.ne.s32.totalorder %s402_s3, %s306_s15  ;;  %p310_p8 = scmp.lt.u32.totalorder %s306_s15, %s402_s3 }
 0x115   :  { %p312_p9 = pnand %p310_p8, %p307_p7 }
 0x117   :  { %315 = shalt.err (!%p312_p9)
}
 0x118   :  { %175 = dma.vmem_to_hbm [thread:$0]  %s170_s12, 512, %s402_s3, [#allocation4], %s323_s22, %s323_s22, %s324_s23  }
 0x119   :  { %320 = dma.done.wait [#allocation4], 512  }
 0x11a   :  { %321 = vsyncadd [#allocation4], 4294966784 }
 0x11b   :  { %179 = vsyncpa [#allocation3], 1 }
 0x11c   :  { %180 = vsyncpa [#allocation6], 1 }
 0x11d   :  { %181 = vsyncpa [#allocation4], 1 }

</bundles_post_ra>
